<compile_context>
chip_gen: v5e
topology: v5e:2x2
jax: 0.10.0
libtpu: 0.0.40
codegen_flags: <defaults>
</compile_context>

<pallas_src>
import jax
import jax.numpy as jnp
from jax.experimental import pallas as pl
from jax.experimental.pallas import tpu as pltpu


def _round_up(x: int, m: int) -> int:
    return ((x + m - 1) // m) * m


def _logistic_hadamard_kernel(s_ref, t_ref, w_ref, b_ref, o_ref):
    # f32 Hadamard on the VPU (upcast covers optional bf16 inputs; v5e has no
    # bf16 VALU), then a single-pass bf16 MXU matmul against the small packed
    # block-diagonal weight with f32 accumulation.  Bias is an SMEM scalar.
    x = s_ref[...].astype(jnp.float32) * t_ref[...].astype(jnp.float32)
    z = jnp.dot(x.astype(jnp.bfloat16), w_ref[...],
                preferred_element_type=jnp.float32)            # (tile, pack)
    z = z + b_ref[0, 0]
    o_ref[...] = jax.nn.sigmoid(z).astype(o_ref.dtype)


def logistic_hadamard(s, t, weight, bias, *, tile_rows: int = 8192):
    """s, t: (N, E) f32 or bf16; weight: (E, 1); bias: scalar/(1,1) -> (N, 1) f32."""
    N, E = s.shape
    assert t.shape == (N, E)

    weight = jnp.asarray(weight, jnp.float32).reshape(E, 1)
    bias2d = jnp.asarray(bias, jnp.float32).reshape(1, 1)

    # Pack `pack` embedding rows per 128-lane register when possible: a free
    # row-major reshape (no copy, no padding) that makes every vector load
    # lane-dense and shrinks VMEM per row (4x at E=32).
    if E < 128 and 128 % E == 0 and N % (128 // E) == 0:
        pack = 128 // E
    else:
        pack = 1   # unpacked fallback: same HBM bytes, just lane-padded VMEM
    lanes = pack * E
    packed_rows = N // pack

    s_p = s.reshape(packed_rows, lanes)
    t_p = t.reshape(packed_rows, lanes)

    # Block-diagonal packed weight (lanes, pack): column g carries `weight` in
    # rows g*E:(g+1)*E, zeros elsewhere, so (s*t)_packed @ w_packed yields the
    # per-row dot products of all `pack` packed rows at once.  bf16 RHS keeps
    # the MXU to a single pass; accumulation stays f32.
    w_packed = jnp.kron(jnp.eye(pack, dtype=jnp.float32),
                        weight).astype(jnp.bfloat16)            # (lanes, pack)

    # Tile selection: multiple of 8 sublanes; keep the grid >= 2 steps so the
    # ("parallel",) axis can use both TensorCores on v7x; the last block may be
    # partial (pl.cdiv grid) -- no input padding is ever needed.
    tile_rows = max(8, _round_up(int(tile_rows), 8))
    tile = max(8, min(tile_rows, _round_up(pl.cdiv(packed_rows, 2), 8)))
    grid = (pl.cdiv(packed_rows, tile),)

    out = pl.pallas_call(
        _logistic_hadamard_kernel,
        out_shape=jax.ShapeDtypeStruct((packed_rows, pack), jnp.float32),
        grid=grid,
        in_specs=[
            pl.BlockSpec((tile, lanes), lambda i: (i, 0)),        # s (streamed)
            pl.BlockSpec((tile, lanes), lambda i: (i, 0)),        # t (streamed)
            pl.BlockSpec((lanes, pack), lambda i: (0, 0)),        # weight (resident)
            pl.BlockSpec(memory_space=pltpu.MemorySpace.SMEM),    # bias scalar
        ],
        out_specs=pl.BlockSpec((tile, pack), lambda i: (i, 0)),
        compiler_params=pltpu.CompilerParams(
            dimension_semantics=("parallel",),
            vmem_limit_bytes=48 * 1024 * 1024),
    )(s_p, t_p, w_packed, bias2d)

    # (packed_rows, pack) row-major flat index r*pack + g is the original row.
    return out.reshape(N, 1)


if __name__ == "__main__":
    key = jax.random.PRNGKey(0)
    k_s, k_t, k_w, k_b = jax.random.split(key, 4)

    N = 1024           # number of (source, target) node pairs
    E = 32             # embedding_length

    s = jax.random.normal(k_s, (N, E), dtype=jnp.float32)
    t = jax.random.normal(k_t, (N, E), dtype=jnp.float32)

    # Deterministic "Linear(E, 1)" parameters (nn.Linear init range), stored
    # as (E, 1) for the matmul layout.
    bound = 1.0 / jnp.sqrt(jnp.float32(E))
    weight = jax.random.uniform(k_w, (E, 1), dtype=jnp.float32,
                                minval=-bound, maxval=bound)
    bias = jax.random.uniform(k_b, (1, 1), dtype=jnp.float32,
                              minval=-bound, maxval=bound)

    # Small tile so the demo exercises a multi-step pipelined grid (grid=(4,)).
    out = logistic_hadamard(s, t, weight, bias, tile_rows=64)
    out = jax.block_until_ready(out)
    assert out.shape == (N, 1)

    # Tight check against a reference using the same bf16-input / f32-accum dot.
    x = s * t
    ref_bf16 = jax.nn.sigmoid(
        jnp.dot(x.astype(jnp.bfloat16), weight.astype(jnp.bfloat16),
                preferred_element_type=jnp.float32) + bias)
    assert jnp.allclose(out, ref_bf16, atol=1e-4, rtol=1e-4)

    # Loose check against the full-f32 PyTorch-equivalent reference (the bf16
    # cast before the MXU dot introduces a small, bounded drift).
    ref_f32 = jax.nn.sigmoid(x @ weight + bias)
    assert jnp.allclose(out, ref_f32, atol=2e-2)

    print("KERNEL_OK")
</pallas_src>

<mosaic_0001>
module attributes {stable_mosaic.version = 11 : i64} {
  func.func @_logistic_hadamard_kernel(%arg0: i32, %arg1: memref<64x128xf32, #tpu.memory_space<vmem>>, %arg2: memref<64x128xf32, #tpu.memory_space<vmem>>, %arg3: memref<128x4xbf16, #tpu.memory_space<vmem>>, %arg4: memref<1x1xf32, #tpu.memory_space<smem>>, %arg5: memref<64x4xf32, #tpu.memory_space<vmem>>) attributes {dimension_semantics = [#tpu.dimension_semantics<parallel>], iteration_bounds = array<i64: 4>, scalar_prefetch = 0 : i64, scratch_operands = 0 : i64, tpu.core_type = #tpu.core_type<tc>, window_params = [{transform_indices = @transform_0, window_bounds = array<i64: 64, 128>}, {transform_indices = @transform_1, window_bounds = array<i64: 64, 128>}, {pipeline_mode = #tpu.pipeline_mode<synchronous>, transform_indices = @transform_2, window_bounds = array<i64: 128, 4>}, {transform_indices = @transform_3, window_bounds = array<i64: 1, 1>}, {transform_indices = @transform_4, window_bounds = array<i64: 64, 4>}]} {
    %c0 = arith.constant 0 : index
    %c0_0 = arith.constant 0 : index
    %0 = vector.load %arg1[%c0, %c0_0] : memref<64x128xf32, #tpu.memory_space<vmem>>, vector<64x128xf32>
    %c0_1 = arith.constant 0 : index
    %c0_2 = arith.constant 0 : index
    %1 = vector.load %arg2[%c0_1, %c0_2] : memref<64x128xf32, #tpu.memory_space<vmem>>, vector<64x128xf32>
    %2 = arith.mulf %0, %1 : vector<64x128xf32>
    %3 = arith.truncf %2 : vector<64x128xf32> to vector<64x128xbf16>
    %c0_3 = arith.constant 0 : index
    %c0_4 = arith.constant 0 : index
    %4 = vector.load %arg3[%c0_3, %c0_4] : memref<128x4xbf16, #tpu.memory_space<vmem>>, vector<128x4xbf16>
    %cst = arith.constant dense<0.000000e+00> : vector<64x4xf32>
    %5 = tpu.matmul %3, %4, %cst {dimension_numbers = #tpu.dot_dimension_numbers<[1], [0], [0], [1], [0, 0, 1, 1], [], []>} : vector<64x128xbf16>, vector<128x4xbf16>, vector<64x4xf32> -> vector<64x4xf32>
    %c0_5 = arith.constant 0 : index
    %c0_6 = arith.constant 0 : index
    %6 = memref.load %arg4[%c0_5, %c0_6] : memref<1x1xf32, #tpu.memory_space<smem>>
    %7 = vector.broadcast %6 : f32 to vector<64x4xf32>
    %8 = arith.addf %5, %7 : vector<64x4xf32>
    %9 = arith.negf %8 : vector<64x4xf32>
    %10 = math.exp %9 : vector<64x4xf32>
    %cst_7 = arith.constant 1.000000e+00 : f32
    %11 = vector.broadcast %cst_7 : f32 to vector<64x4xf32>
    %12 = arith.addf %11, %10 : vector<64x4xf32>
    %13 = arith.divf %11, %12 : vector<64x4xf32>
    %c0_8 = arith.constant 0 : index
    %c0_9 = arith.constant 0 : index
    %14 = vector.load %arg5[%c0_8, %c0_9] : memref<64x4xf32, #tpu.memory_space<vmem>>, vector<64x4xf32>
    tpu.vector_store %arg5[%c0_8, %c0_9], %13 {strides = array<i32>} : memref<64x4xf32, #tpu.memory_space<vmem>>, vector<64x4xf32>,
    return
  }
  func.func @transform_0(%arg0: i32) -> (i32, i32) {
    %c0_i32 = arith.constant 0 : i32
    %c0_i32_0 = arith.constant 0 : i32
    return %arg0, %c0_i32 : i32, i32
  }
  func.func @transform_1(%arg0: i32) -> (i32, i32) {
    %c0_i32 = arith.constant 0 : i32
    %c0_i32_0 = arith.constant 0 : i32
    return %arg0, %c0_i32 : i32, i32
  }
  func.func @transform_2(%arg0: i32) -> (i32, i32) {
    %c0_i32 = arith.constant 0 : i32
    %c0_i32_0 = arith.constant 0 : i32
    %c0_i32_1 = arith.constant 0 : i32
    return %c0_i32, %c0_i32_0 : i32, i32
  }
  func.func @transform_3(%arg0: i32) -> (i32, i32) {
    %c0_i32 = arith.constant 0 : i32
    %c0_i32_0 = arith.constant 0 : i32
    %c0_i32_1 = arith.constant 0 : i32
    return %c0_i32, %c0_i32_0 : i32, i32
  }
  func.func @transform_4(%arg0: i32) -> (i32, i32) {
    %c0_i32 = arith.constant 0 : i32
    %c0_i32_0 = arith.constant 0 : i32
    return %arg0, %c0_i32 : i32, i32
  }
}

</mosaic_0001>

<bundles_post_ra>
// kernel: tpu_custom_call.1
= control target key start
LH: loop header
LB: loop body
LE: loop exit
PB: predicated region body
PF: predicated region fallthrough
CT: control target
= control target key end

     0   :  { %s1202_s0 = inlined_call_operand.hbm [shape: f32[256,128], index: 0, kind: input, shape index: {}]   ;;  %s1203_s1 = inlined_call_operand.hbm [shape: f32[256,128], index: 1, kind: input, shape index: {}]   ;;  %s1204_s2 = inlined_call_operand.vmem [shape: bf16[128,4], index: 2, kind: input, shape index: {}]   ;;  %s1205_s3 = inlined_call_operand.<no memory space> [shape: f32[1,1], index: 3, kind: input, shape index: {}]   ;;  %s1206_s4 = inlined_call_operand.vmem [shape: f32[256,4], index: 4, kind: output, shape index: {}]  }
   0x1   :  { %9 = sst [smem:[#allocation2]] %s1205_s3 }
   0x2   :  { %10 = vsyncpa [#allocation4], 0 }
   0x3   :  { %12 = vsyncpa [#allocation4 + $0x1], 0 }
   0x4   :  { %13 = vsyncpa [#allocation6], 0 }
   0x5   :  { %15 = vsyncpa [#allocation6 + $0x1], 0  ;;  %s939_s17 = smov 0   ;;  %s941_s18 = smov 0  }
   0x6   :  { %s943_s19 = smov 0   ;;  %s945_s20 = smov 0  }
   0x7 LB: > { %s640_s3 = sadd.s32 4294967295, %s907_s20   ;;  %s959_s21 = sadd.s32 1, %s907_s20   ;;  %s907_s20 = sphi %s945_s20, %s1220_s20   ;;  %s903_s19 = sphi %s943_s19, %s1219_s19   ;;  %s899_s18 = sphi %s941_s18, %s1218_s18   ;;  %s895_s17 = sphi %s939_s17, %s1217_s17  }
   0x8   : > { %s25_s22 = ssub.s32 %s907_s20, %s959_s21  ;;  %s28_s23 = sadd.s32 1, %s903_s19 }
   0x9   : > { %p26_p0 = scmp.eq.s32.totalorder %s25_s22, 0  ;;  %p35_p1 = scmp.ne.s32.totalorder %s903_s19, %s899_s18 }
   0xa   : > { %p36_p2 = scmp.eq.s32.totalorder %s907_s20, 0  ;;  %p41_p3 = scmp.ne.s32.totalorder %s899_s18, %s895_s17 }
   0xb   : > { %s969_s24 = scalar_select %p26_p0, %s903_s19, %s28_s23  }
   0xc   : > { %p971_p4 = por %p36_p2, %p35_p1  ;;  %p42_p5 = scmp.eq.s32.totalorder %s640_s3, 0 }
   0xd   : > { %p742_p6 = scmp.lt.s32.totalorder %s907_s20, 4  ;;  %s983_s27 = sand.u32 1, %s903_s19  }
   0xe   : > { %p978_p7 = por %p42_p5, %p41_p3  ;;  %s644_s28 = sshll.u32 %s983_s27, 6 }
   0xf   : > { %s697_s29 = sshll.u32 %s907_s20, 6  ;;  %s169_s7 = scalar_lea.vmem [#allocation3], %s644_s28 }
  0x10   : > { %s174_s6 = scalar_lea.hbm %s1202_s0, %s697_s29  ;;  %s177_s8 = sshll.u32 %s169_s7, 4  ;;  %s178_s8 = int_to_ptr.vmem [resolvable:$true] %s177_s8 }
  0x11   : > { %s175_s9 = sshll.u32 %s174_s6, 4  ;;  %p996_p8 = pnand %p742_p6, %p971_p4  ;;  %s176_s9 = int_to_ptr.hbm [resolvable:$true] %s175_s9 }
  0x12   : > { %p650_p9 = scmp.ge.s32.totalorder %s907_s20, 1  ;;  %s166_s11 = scalar_lea.sflag [#allocation4], %s983_s27 }
  0x13   : > { %s809_s12 = sshra.s32 %s176_s9, 4  ;;  %p813_p11 = pneg %p996_p8  ;;  %s810_s12 = int_to_ptr.hbm [resolvable:$true] %s809_s12 }
  0x14   : > { %s811_s13 = scalar_lea.hbm %s810_s12, 64  ;;  %s816_s16 = scalar_lea.hbm %s1202_s0, 256 }
  0x15   : > { %p812_p10 = scmp.ne.s32.totalorder %s810_s12, %s811_s13  ;;  %p817_p0 = scmp.lt.s32.totalorder %s810_s12, %s1202_s0 }
  0x16   : > { %p818_p1 = scmp.lt.s32.totalorder %s816_s16, %s811_s13 }
  0x17   : > { %p814_p12 = pnand %p813_p11, %p812_p10 }
  0x18   : > { %p819_p2 = por %p818_p1, %p817_p0 }
  0x19   : > { %p815_p13 = pneg %p814_p12 }
  0x1b   : > { %p820_p3 = pnand %p819_p2, %p815_p13 }
  0x1d   : > { %823 = shalt.err (!%p820_p3)
}
  0x1e   : > { %s909_s23 = smov 128   ;;  %s910_s25 = smov 8  }
  0x1f   : > { %738 = dma.hbm_to_vmem [thread:$0]  (!%p996_p8), %s176_s9, 1024, %s178_s8, %s166_s11, %s909_s23, %s909_s23, %s910_s25  }
  0x20   : > { %p207_p4 = scmp.lt.s32.totalorder %s907_s20, 5  ;;  %s196_s6 = scalar_lea.hbm %s1203_s1, %s697_s29 }
  0x21   : > { %s197_s12 = sshll.u32 %s196_s6, 4  ;;  %s191_s13 = scalar_lea.vmem [#allocation5], %s644_s28  ;;  %s198_s12 = int_to_ptr.hbm [resolvable:$true] %s197_s12 }
  0x22   : > { %p1023_p5 = pnand %p650_p9, %p207_p4  ;;  %s199_s14 = sshll.u32 %s191_s13, 4  ;;  %s200_s14 = int_to_ptr.vmem [resolvable:$true] %s199_s14 }
  0x23   : > { %s188_s15 = scalar_lea.sflag [#allocation6], %s983_s27  ;;  %s839_s16 = sshra.s32 %s198_s12, 4  ;;  %s840_s16 = int_to_ptr.hbm [resolvable:$true] %s839_s16 }
  0x24   : > { %s841_s8 = scalar_lea.hbm %s840_s16, 64  ;;  %s846_s11 = scalar_lea.hbm %s1203_s1, 256 }
  0x25   : > { %p842_p6 = scmp.ne.s32.totalorder %s840_s16, %s841_s8  ;;  %p847_p9 = scmp.lt.s32.totalorder %s840_s16, %s1203_s1 }
  0x26   : > { %p848_p13 = scmp.lt.s32.totalorder %s846_s11, %s841_s8 }
  0x27   : > { %p844_p10 = pnand %p842_p6, %p813_p11 }
  0x28   : > { %p849_p0 = por %p848_p13, %p847_p9 }
  0x29   : > { %p845_p12 = pneg %p844_p10 }
  0x2b   : > { %p850_p1 = pnand %p849_p0, %p845_p12 }
  0x2d   : > { %853 = shalt.err (!%p850_p1)
}
  0x2e   : > { %741 = dma.hbm_to_vmem [thread:$0]  (!%p996_p8), %s198_s12, 1024, %s200_s14, %s188_s15, %s909_s23, %s909_s23, %s910_s25  }
  0x2f   : > { %211 = sbr.rel (%p1023_p5) target bundleno = 263 (0x107), region = 36  ;;  %s213_s27 = sand.u32 (!%p1023_p5), 1, %s899_s18  }
  0x30   : > { %s651_s28 = sshll.u32 (!%p1023_p5), %s213_s27, 6  ;;  %s214_s30 = scalar_lea.sflag (!%p1023_p5), [#allocation4], %s213_s27 }
  0x31   : > { %s1044_s5 = scalar_lea.vmem (!%p1023_p5), [#allocation3], %s651_s28 }
  0x34   : > { %886 = dma.done.wait (%p978_p7), %s214_s30, 1024  }
  0x35   : > { %888 = vsyncadd (%p978_p7), %s214_s30, 4294966272  ;;  %s224_s6 = scalar_lea.sflag [#allocation6], %s213_s27  ;;  %s1050_s13 = scalar_lea.vmem [#allocation5], %s651_s28 }
  0x36   : > { %890 = dma.done.wait (%p978_p7), %s224_s6, 1024  }
  0x37   : > { %892 = vsyncadd (%p978_p7), %s224_s6, 4294966272  ;;  %v706_v0 = vld [vmem:[%s1204_s2 + $0x38] sm:$0xff]  ;;  %v705_v1 = vld [vmem:[%s1204_s2 + $0x30] sm:$0xff]  ;;  %s310_s28 = sld [smem:[#allocation2]]  ;;  %s653_s30 = sshll.u32 %s640_s3, 3  ;;  %vm541_vm5 = vcmask 31744  }
  0x38   : > { %360 = vmatpush.bf16.msra.mxu0 %v706_v0  ;;  %707 = vmatpush.bf16.msra.mxu1 %v706_v0  ;;  %v704_v2 = vld [vmem:[%s1204_s2 + $0x28] sm:$0xff]  ;;  %v703_v3 = vld [vmem:[%s1204_s2 + $0x20] sm:$0xff]  ;;  %v702_v4 = vld [vmem:[%s1204_s2 + $0x18] sm:$0xff]  ;;  %p261_p7 = scmp.lt.s32.totalorder %s653_s30, 31 }
  0x39   : > { %708 = vmatpush.bf16.msra.mxu2 %v706_v0  ;;  %709 = vmatpush.bf16.msra.mxu3 %v706_v0  ;;  %v701_v5 = vld [vmem:[%s1204_s2 + $0x10] sm:$0xff]  ;;  %v266_v6 = vld [vmem:[%s1044_s5] sm:$0xff]  ;;  %v700_v8 = vld [vmem:[%s1204_s2 + $0x8] sm:$0xff] }
  0x3a   : > { %v274_v7 = vld [vmem:[%s1050_s13] sm:$0xff]  ;;  %v267_v9 = vld [vmem:[%s1044_s5 + $0x8] sm:$0xff]  ;;  %v268_v11 = vld [vmem:[%s1044_s5 + $0x10] sm:$0xff]  ;;  %s1222_s30 = smov (!%p261_p7, %s653_s30), 31 }
  0x3b   : > { %v275_v10 = vld [vmem:[%s1050_s13 + $0x8] sm:$0xff]  ;;  %v269_v12 = vld [vmem:[%s1044_s5 + $0x18] sm:$0xff]  ;;  %v276_v13 = vld [vmem:[%s1050_s13 + $0x10] sm:$0xff]  ;;  %v282_v23 = vmul.f32 %v274_v7, %v266_v6  ;;  %s654_s20 = sshll.u32 %s1222_s30, 3 }
  0x3c   : > { %361 = vmatpush.bf16.msra.mxu0 %v705_v1  ;;  %710 = vmatpush.bf16.msra.mxu1 %v705_v1  ;;  %v277_v14 = vld [vmem:[%s1050_s13 + $0x18] sm:$0xff]  ;;  %v270_v15 = vld [vmem:[%s1044_s5 + $0x20] sm:$0xff]  ;;  %v271_v16 = vld [vmem:[%s1044_s5 + $0x28] sm:$0xff]  ;;  %v283_v24 = vmul.f32 %v275_v10, %v267_v9  ;;  %v284_v25 = vmul.f32 %v276_v13, %v268_v11  ;;  %s1119_s6 = scalar_lea.vmem %s1206_s4, %s654_s20 }
  0x3d   : > { %711 = vmatpush.bf16.msra.mxu2 %v705_v1  ;;  %712 = vmatpush.bf16.msra.mxu3 %v705_v1  ;;  %v278_v17 = vld [vmem:[%s1050_s13 + $0x20] sm:$0xff]  ;;  %v279_v18 = vld [vmem:[%s1050_s13 + $0x28] sm:$0xff]  ;;  %v272_v19 = vld [vmem:[%s1044_s5 + $0x30] sm:$0xff]  ;;  %v285_v26 = vmul.f32 %v277_v14, %v269_v12  ;;  %v311_v36 = vstv %s310_s28 }
  0x3e   : > { %v273_v20 = vld [vmem:[%s1044_s5 + $0x38] sm:$0xff]  ;;  %v280_v21 = vld [vmem:[%s1050_s13 + $0x30] sm:$0xff]  ;;  %v286_v27 = vmul.f32 %v278_v17, %v270_v15  ;;  %v699_v28 = vld [vmem:[%s1204_s2] sm:$0xff]  ;;  %v287_v29 = vmul.f32 %v279_v18, %v271_v16  ;;  %v290_v32 = vpack.c.bf16 %v283_v24, %v282_v23 }
  0x3f   : > { %v281_v22 = vld [vmem:[%s1050_s13 + $0x38] sm:$0xff]  ;;  %v288_v30 = vmul.f32 %v280_v21, %v272_v19  ;;  %v291_v33 = vpack.c.bf16 %v285_v26, %v284_v25 }
  0x40   : > { %362 = vmatpush.bf16.msra.mxu0 %v704_v2  ;;  %713 = vmatpush.bf16.msra.mxu1 %v704_v2  ;;  %v289_v31 = vmul.f32 %v281_v22, %v273_v20  ;;  %v292_v34 = vpack.c.bf16 %v287_v29, %v286_v27 }
  0x41   : > { %714 = vmatpush.bf16.msra.mxu2 %v704_v2  ;;  %715 = vmatpush.bf16.msra.mxu3 %v704_v2 }
  0x42   : > { %v293_v35 = vpack.c.bf16 %v289_v31, %v288_v30 }
  0x44   : > { %363 = vmatpush.bf16.msra.mxu0 %v703_v3  ;;  %716 = vmatpush.bf16.msra.mxu1 %v703_v3 }
  0x45   : > { %717 = vmatpush.bf16.msra.mxu2 %v703_v3  ;;  %718 = vmatpush.bf16.msra.mxu3 %v703_v3 }
  0x48   : > { %364 = vmatpush.bf16.msra.mxu0 %v702_v4  ;;  %719 = vmatpush.bf16.msra.mxu1 %v702_v4 }
  0x49   : > { %720 = vmatpush.bf16.msra.mxu2 %v702_v4  ;;  %721 = vmatpush.bf16.msra.mxu3 %v702_v4 }
  0x4c   : > { %365 = vmatpush.bf16.msra.mxu0 %v701_v5  ;;  %722 = vmatpush.bf16.msra.mxu1 %v701_v5 }
  0x4d   : > { %723 = vmatpush.bf16.msra.mxu2 %v701_v5  ;;  %724 = vmatpush.bf16.msra.mxu3 %v701_v5 }
  0x50   : > { %366 = vmatpush.bf16.msra.mxu0 %v700_v8  ;;  %725 = vmatpush.bf16.msra.mxu1 %v700_v8 }
  0x51   : > { %726 = vmatpush.bf16.msra.mxu2 %v700_v8  ;;  %727 = vmatpush.bf16.msra.mxu3 %v700_v8 }
  0x54   : > { %367 = vmatpush.bf16.msra.mxu0 %v699_v28  ;;  %728 = vmatpush.bf16.msra.mxu1 %v699_v28 }
  0x55   : > { %729 = vmatpush.bf16.msra.mxu2 %v699_v28  ;;  %730 = vmatpush.bf16.msra.mxu3 %v699_v28 }
  0x57   : > { %368 = vmatmul.bf16.vlgmr.msra.gmra.mxu0 %v290_v32  ;;  %373 = vmatmul.bf16.vlgmr.msra.gmra.mxu1 %v291_v33 }
  0x58   : > { %378 = vmatmul.bf16.vlgmr.msra.gmra.mxu2 %v292_v34  ;;  %383 = vmatmul.bf16.vlgmr.msra.gmra.mxu3 %v293_v35 }
  0xd4   : > { %v369_v37 = vpop.f32.mrf.mxu0  ;;  %v374_v38 = vpop.f32.mrf.mxu1 }
  0xd5   : > { %v370_v39 = vadd.f32 %v369_v37, %v311_v36  ;;  %v375_v40 = vadd.f32 %v374_v38, %v311_v36 }
  0xd7   : > { %v687_v41 = vmul.f32 -1.442695, %v370_v39  ;;  %v689_v42 = vmul.f32 -1.442695, %v375_v40 }
  0xd9   : > { %777 = vpow2.f32 %v687_v41 }
  0xda   : > { %779 = vpow2.f32 %v689_v42 }
  0xdb   : > { %v379_v43 = vpop.f32.mrf.mxu2  ;;  %v384_v44 = vpop.f32.mrf.mxu3 }
  0xdc   : > { %v380_v45 = vadd.f32 %v379_v43, %v311_v36  ;;  %v385_v46 = vadd.f32 %v384_v44, %v311_v36  ;;  %v371_v47 = vpop.f32.mrf.mxu0  ;;  %v376_v48 = vpop.f32.mrf.mxu1 }
  0xdd   : > { %v372_v49 = vadd.f32 %v371_v47, %v311_v36  ;;  %v377_v50 = vadd.f32 %v376_v48, %v311_v36 }
  0xde   : > { %v691_v51 = vmul.f32 -1.442695, %v380_v45  ;;  %v693_v52 = vmul.f32 -1.442695, %v385_v46 }
  0xdf   : > { %v778_v53 = vpop.eup %777  ;;  %v688_v56 = vmul.f32 -1.442695, %v372_v49  ;;  %v690_v58 = vmul.f32 -1.442695, %v377_v50 }
  0xe0   : > { %v780_v54 = vpop.eup %779  ;;  %v413_v55 = vadd.f32 1.0, %v778_v53  ;;  %781 = vpow2.f32 %v691_v51 }
  0xe1   : > { %v415_v57 = vadd.f32 1.0, %v780_v54  ;;  %783 = vpow2.f32 %v693_v52 }
  0xe2   : > { %785 = vrcp.f32 %v413_v55  ;;  %vm426_vm0 = vweird.f32 %v413_v55  ;;  %v430_v12 = vand.u32 2147483647, %v413_v55  ;;  %v432_v13 = vand.u32 2147483648, %v413_v55 }
  0xe3   : > { %787 = vrcp.f32 %v415_v57  ;;  %v381_v59 = vpop.f32.mrf.mxu2  ;;  %v386_v60 = vpop.f32.mrf.mxu3  ;;  %v460_v15 = vand.u32 2147483647, %v415_v57  ;;  %v462_v16 = vand.u32 2147483648, %v415_v57  ;;  %vm456_vm2 = vweird.f32 %v415_v57 }
  0xe4   : > { %789 = vpow2.f32 %v688_v56  ;;  %v382_v61 = vadd.f32 %v381_v59, %v311_v36  ;;  %v387_v0 = vadd.f32 %v386_v60, %v311_v36  ;;  %vm1111_vm4 = vcmp.eq.f32.partialorder %v430_v12, 8.507059e+37 }
  0xe5   : > { %791 = vpow2.f32 %v690_v58  ;;  %v433_v25 = vor.u32 1.1754944e-38, %v432_v13  ;;  %vm461_vm7 = vcmp.eq.f32.partialorder %v460_v15, 8.507059e+37  ;;  %v463_v30 = vor.u32 1.1754944e-38, %v462_v16 }
  0xe6   : > { %v782_v62 = vpop.eup %781  ;;  %v692_v63 = vmul.f32 -1.442695, %v382_v61  ;;  %v694_v9 = vmul.f32 -1.442695, %v387_v0 }
  0xe7   : > { %v784_v1 = vpop.eup %783  ;;  %v1098_v2 = vadd.f32 1.0, %v782_v62 }
  0xe8   : > { %v786_v3 = vpop.eup %785  ;;  %v1100_v4 = vadd.f32 1.0, %v784_v1 }
  0xe9   : > { %v788_v5 = vpop.eup %787  ;;  %v422_v6 = vmul.f32 %v786_v3, %v413_v55  ;;  %793 = vrcp.f32 %v1098_v2  ;;  %vm427_vm1 = vweird.f32 %v786_v3  ;;  %v490_v31 = vand.u32 2147483647, %v1098_v2 }
  0xea   : > { %v790_v7 = vpop.eup %789  ;;  %v452_v8 = vmul.f32 %v788_v5, %v415_v57  ;;  %795 = vpow2.f32 %v692_v63  ;;  %vm457_vm3 = vweird.f32 %v788_v5  ;;  %vm428_vm6 = vmor %vm426_vm0, %vm427_vm1  ;;  %v492_v37 = vand.u32 2147483648, %v1098_v2 }
  0xeb   : > { %v792_v10 = vpop.eup %791  ;;  %v423_v11 = vsub.f32 1.0, %v422_v6  ;;  %797 = vrcp.f32 %v1100_v4  ;;  %v1107_v18 = vadd.f32 1.0, %v790_v7  ;;  %vm458_vm8 = vmor %vm456_vm2, %vm457_vm3  ;;  %v520_v38 = vand.u32 2147483647, %v1100_v4 }
  0xec   : > { %v453_v14 = vsub.f32 1.0, %v452_v8  ;;  %v1109_v19 = vadd.f32 1.0, %v792_v10  ;;  %799 = vpow2.f32 %v694_v9  ;;  %v522_v39 = vand.u32 2147483648, %v1100_v4 }
  0xed   : > { %v424_v17 = vmul.f32 %v786_v3, %v423_v11  ;;  %801 = vrcp.f32 %v1107_v18  ;;  %vm486_vm10 = vweird.f32 %v1098_v2  ;;  %vm1140_vm11 = vcmp.eq.f32.partialorder %v490_v31, 8.507059e+37 }
  0xee   : > { %v454_v20 = vmul.f32 %v788_v5, %v453_v14  ;;  %803 = vrcp.f32 %v1109_v19  ;;  %vm516_vm12 = vweird.f32 %v1100_v4  ;;  %v493_v51 = vor.u32 1.1754944e-38, %v492_v37 }
  0xef   : > { %v794_v21 = vpop.eup %793  ;;  %v425_v22 = vadd.f32 %v786_v3, %v424_v17  ;;  %vm1148_vm15 = vcmp.eq.f32.partialorder %v520_v38, 8.507059e+37  ;;  %v523_v53 = vor.u32 1.1754944e-38, %v522_v39  ;;  %v445_v59 = vand.u32 2147483647, %v1107_v18 }
  0xf0   : > { %v796_v24 = vpop.eup %795  ;;  %v455_v26 = vadd.f32 %v788_v5, %v454_v20  ;;  %v482_v27 = vmul.f32 %v794_v21, %v1098_v2  ;;  %vm487_vm9 = vweird.f32 %v794_v21  ;;  %v447_v60 = vand.u32 2147483648, %v1107_v18 }
  0xf1   : > { %v798_v28 = vpop.eup %797  ;;  %v429_v29 = vsel %vm428_vm6, %v786_v3, %v425_v22  ;;  %v1137_v43 = vadd.f32 1.0, %v796_v24  ;;  %vm488_vm14 = vmor %vm486_vm10, %vm487_vm9  ;;  %vm441_vm2 = vweird.f32 %v1107_v18  ;;  %v477_v1 = vand.u32 2147483648, %v1109_v19 }
  0xf2   : > { %v434_v32 = vsel %vm1111_vm4, %v433_v25, %v429_v29  ;;  %v459_v33 = vsel %vm458_vm8, %v788_v5, %v455_v26  ;;  %v483_v34 = vsub.f32 1.0, %v482_v27  ;;  %v512_v35 = vmul.f32 %v798_v28, %v1100_v4  ;;  %v800_v40 = vpop.eup %799 }
  0xf3   : > { %542 = vst.msk [vmem:[%s1119_s6] sm:$0xff] %vm541_vm5, %v434_v32  ;;  %v464_v36 = vsel %vm461_vm7, %v463_v30, %v459_v33  ;;  %v802_v44 = vpop.eup %801  ;;  %vm517_vm13 = vweird.f32 %v798_v28  ;;  %v1146_v49 = vadd.f32 1.0, %v800_v40  ;;  %805 = vrcp.f32 %v1137_v43 }
  0xf4   : > { %544 = vst.msk [vmem:[%s1119_s6 + $0x10] sm:$0xff] %vm541_vm5, %v464_v36  ;;  %v484_v41 = vmul.f32 %v794_v21, %v483_v34  ;;  %v513_v42 = vsub.f32 1.0, %v512_v35  ;;  %v437_v48 = vmul.f32 %v802_v44, %v1107_v18  ;;  %v804_v50 = vpop.eup %803  ;;  %vm518_vm0 = vmor %vm516_vm12, %vm517_vm13  ;;  %vm442_vm1 = vweird.f32 %v802_v44 }
  0xf5   : > { %v467_v57 = vmul.f32 %v804_v50, %v1109_v19  ;;  %807 = vrcp.f32 %v1146_v49  ;;  %vm472_vm3 = vweird.f32 %v804_v50  ;;  %v475_v4 = vand.u32 2147483647, %v1109_v19  ;;  %vm443_vm4 = vmor %vm441_vm2, %vm442_vm1 }
  0xf6   : > { %v485_v46 = vadd.f32 %v794_v21, %v484_v41  ;;  %v514_v47 = vmul.f32 %v798_v28, %v513_v42  ;;  %v438_v56 = vsub.f32 1.0, %v437_v48  ;;  %vm446_vm6 = vcmp.eq.f32.partialorder %v445_v59, 8.507059e+37 }
  0xf7   : > { %v468_v63 = vsub.f32 1.0, %v467_v57  ;;  %v448_v6 = vor.u32 1.1754944e-38, %v447_v60  ;;  %vm471_vm7 = vweird.f32 %v1109_v19  ;;  %v478_v11 = vor.u32 1.1754944e-38, %v477_v1 }
  0xf8   : > { %v489_v54 = vsel %vm488_vm14, %v794_v21, %v485_v46  ;;  %v515_v55 = vadd.f32 %v798_v28, %v514_v47  ;;  %v439_v62 = vmul.f32 %v802_v44, %v438_v56  ;;  %vm473_vm8 = vmor %vm471_vm7, %vm472_vm3  ;;  %vm476_vm9 = vcmp.eq.f32.partialorder %v475_v4, 8.507059e+37 }
  0xf9   : > { %v494_v58 = vsel %vm1140_vm11, %v493_v51, %v489_v54  ;;  %v469_v3 = vmul.f32 %v804_v50, %v468_v63  ;;  %v806_v5 = vpop.eup %805  ;;  %v507_v16 = vand.u32 2147483648, %v1137_v43  ;;  %v505_v19 = vand.u32 2147483647, %v1137_v43 }
  0xfa   : > { %546 = vst.msk [vmem:[%s1119_s6 + $0x20] sm:$0xff] %vm541_vm5, %v494_v58  ;;  %v519_v61 = vsel %vm518_vm0, %v798_v28, %v515_v55  ;;  %v440_v2 = vadd.f32 %v802_v44, %v439_v62  ;;  %v497_v9 = vmul.f32 %v806_v5, %v1137_v43  ;;  %vm502_vm10 = vweird.f32 %v806_v5 }
  0xfb   : > { %v524_v0 = vsel %vm1148_vm15, %v523_v53, %v519_v61  ;;  %v470_v8 = vadd.f32 %v804_v50, %v469_v3  ;;  %v808_v12 = vpop.eup %807  ;;  %vm501_vm11 = vweird.f32 %v1137_v43  ;;  %v537_v22 = vand.u32 2147483648, %v1146_v49 }
  0xfc   : > { %548 = vst.msk [vmem:[%s1119_s6 + $0x30] sm:$0xff] %vm541_vm5, %v524_v0  ;;  %v444_v7 = vsel %vm443_vm4, %v802_v44, %v440_v2  ;;  %v498_v14 = vsub.f32 1.0, %v497_v9  ;;  %v527_v17 = vmul.f32 %v808_v12, %v1146_v49  ;;  %vm503_vm12 = vmor %vm501_vm11, %vm502_vm10  ;;  %v508_v23 = vor.u32 1.1754944e-38, %v507_v16 }
  0xfd   : > { %v449_v10 = vsel %vm446_vm6, %v448_v6, %v444_v7  ;;  %v474_v13 = vsel %vm473_vm8, %v804_v50, %v470_v8  ;;  %vm532_vm13 = vweird.f32 %v808_v12  ;;  %v535_v25 = vand.u32 2147483647, %v1146_v49 }
  0xfe   : > { %543 = vst.msk [vmem:[%s1119_s6 + $0x8] sm:$0xff] %vm541_vm5, %v449_v10  ;;  %v479_v15 = vsel %vm476_vm9, %v478_v11, %v474_v13  ;;  %v499_v18 = vmul.f32 %v806_v5, %v498_v14  ;;  %v528_v20 = vsub.f32 1.0, %v527_v17  ;;  %vm506_vm14 = vcmp.eq.f32.partialorder %v505_v19, 8.507059e+37 }
  0xff   : > { %545 = vst.msk [vmem:[%s1119_s6 + $0x18] sm:$0xff] %vm541_vm5, %v479_v15  ;;  %vm531_vm15 = vweird.f32 %v1146_v49  ;;  %v538_v29 = vor.u32 1.1754944e-38, %v537_v22  ;;  %vm536_vm1 = vcmp.eq.f32.partialorder %v535_v25, 8.507059e+37 }
 0x100   : > { %v500_v21 = vadd.f32 %v806_v5, %v499_v18  ;;  %v529_v24 = vmul.f32 %v808_v12, %v528_v20  ;;  %vm533_vm0 = vmor %vm531_vm15, %vm532_vm13 }
 0x102   : > { %v504_v26 = vsel %vm503_vm12, %v806_v5, %v500_v21  ;;  %v530_v28 = vadd.f32 %v808_v12, %v529_v24 }
 0x103   : > { %v509_v27 = vsel %vm506_vm14, %v508_v23, %v504_v26 }
 0x104   : > { %547 = vst.msk [vmem:[%s1119_s6 + $0x28] sm:$0xff] %vm541_vm5, %v509_v27  ;;  %v534_v30 = vsel %vm533_vm0, %v808_v12, %v530_v28 }
 0x105   : > { %v539_v31 = vsel %vm536_vm1, %v538_v29, %v534_v30 }
 0x106   : > { %549 = vst.msk [vmem:[%s1119_s6 + $0x38] sm:$0xff] %vm541_vm5, %v539_v31 }
 0x107 PF: > { %p18_p8 = scmp.ge.s32.totalorder %s959_s21, 6   ;;  %s1217_s17 = smov %s899_s18 }
 0x108   : > { %s1218_s18 = smov %s903_s19  ;;  %s1219_s19 = smov %s969_s24 }
 0x109   : > { %s1220_s20 = smov %s959_s21  ;;  %20 = sbr.rel (!%p18_p8) target bundleno = 7 (0x7), region = 89 }
 0x10e   :  { %572 = vsyncpa [#allocation4], 1 }
 0x10f   :  { %574 = vsyncpa [#allocation4 + $0x1], 1 }
 0x110   :  { %575 = vsyncpa [#allocation6], 1 }
 0x111   :  { %577 = vsyncpa [#allocation6 + $0x1], 1 }

</bundles_post_ra>
